<compile_context>
chip_gen: v7x
topology: tpu7x:2x2x1
jax: 0.10.0
libtpu: 0.0.40
codegen_flags: <defaults>
</compile_context>

<pallas_src>
import jax
import jax.numpy as jnp
from jax import lax
from jax.experimental import pallas as pl
from jax.experimental.pallas import tpu as pltpu


def atae_lstm_kernel(maxlen_ref,                  # SMEM (1,) int32 : batch max length
                     len_ref,                     # (BB, 1) int32   : per-sequence lengths
                     x_ref,                       # (T, BB, E)      : word embeddings
                     gconst_ref,                  # (BB, 4H)        : asp@W_ih_a + b (hoisted)
                     w_ih_x_ref,                  # (E, 4H)         : word part of W_ih
                     w_hh_ref,                    # (H, 4H)
                     v_att_ref,                   # (1, H)          : folded attention vector
                     w_d_ref, b_d_ref,            # (H, Pp), (1, Pp): dense head (lane-padded)
                     out_ref,                     # (BB, Pp)
                     h_all_ref,                   # scratch VMEM (T, BB, H)
                     gx_ref,                      # scratch VMEM (T, BB, 4H)
                     h_ref, c_ref):               # scratch VMEM (BB, H) each
    T, BB, E = x_ref.shape
    H = w_hh_ref.shape[0]

    lens = len_ref[...]                                               # (BB, 1) int32
    w_hh = w_hh_ref[...]                                              # (H, 4H)
    nt = maxlen_ref[0]                                                # runtime max length

    # Scratch persists across grid iterations / starts uninitialized; rows
    # t >= nt must be zero because pooled = sum_t(score * h_all) and the
    # -1e30 softmax mask cannot protect against 0 * NaN.
    h_all_ref[...] = jnp.zeros_like(h_all_ref)
    h_ref[...] = jnp.zeros_like(h_ref)
    c_ref[...] = jnp.zeros_like(c_ref)

    # ---- hoisted input projection: one (T*BB, E) @ (E, 4H) matmul ----
    x2 = x_ref[...].reshape(T * BB, E)
    gate_x = jnp.dot(x2, w_ih_x_ref[...],
                     preferred_element_type=jnp.float32)              # (T*BB, 4H)
    gx_ref[...] = gate_x.reshape(T, BB, 4 * H) + gconst_ref[...][None, :, :]

    # ---- LSTM recurrence, bounded by the runtime batch-max length ----
    # Gate column layout is (i, f, o, g).
    @pl.loop(0, nt)
    def _(t):
        h = h_ref[...]
        c = c_ref[...]
        gates = gx_ref[t] + jnp.dot(h, w_hh,
                                    preferred_element_type=jnp.float32)  # (BB, 4H)
        # Full-vreg activations: one sigmoid + one tanh over all 4H lanes.
        sig = jax.nn.sigmoid(gates)
        tnh = jnp.tanh(gates)
        i_g = sig[:, 0:H]
        f_g = sig[:, H:2 * H]
        o_g = sig[:, 2 * H:3 * H]
        g_g = tnh[:, 3 * H:4 * H]
        c_new = f_g * c + i_g * g_g
        h_new = o_g * jnp.tanh(c_new)

        # pack_padded / pad_packed semantics: zero output past the valid length
        # and freeze the recurrent state.
        valid = t < lens                                               # (BB, 1)
        h_all_ref[t] = jnp.where(valid, h_new, 0.0)
        h_ref[...] = jnp.where(valid, h_new, h)
        c_ref[...] = jnp.where(valid, c_new, c)

    h_all = h_all_ref[...]                                             # (T, BB, H)

    # ---- NoQueryAttention, folded: logits[t,b] = <h[t,b], v> ----
    # (the per-row constant (asp@W_k_a + b_k).qw cancels in the time softmax)
    v = v_att_ref[...]                                                  # (1, H)
    logits = jnp.sum(h_all * v[None, :, :], axis=-1, keepdims=True)     # (T, BB, 1)

    # Mask timesteps beyond the runtime batch-max length (squeeze_embedding).
    t_idx = lax.broadcasted_iota(jnp.int32, (T, BB, 1), 0)
    logits = jnp.where(t_idx < nt, logits, -1e30)

    m = jnp.max(logits, axis=0, keepdims=True)
    e = jnp.exp(logits - m)
    score = e / jnp.sum(e, axis=0, keepdims=True)                       # (T, BB, 1)

    pooled = jnp.sum(score * h_all, axis=0)                             # (BB, H)
    out_ref[...] = (jnp.dot(pooled, w_d_ref[...],
                            preferred_element_type=jnp.float32)
                    + b_d_ref[...])                                      # (BB, Pp)


def _round_up(x, m):
    return ((x + m - 1) // m) * m


def _reorder_gates(w, H):
    # PyTorch LSTM packs gate columns as (i, f, g, o); the kernel wants the
    # three sigmoid gates contiguous: (i, f, o, g).
    return jnp.concatenate(
        [w[..., 0:2 * H], w[..., 3 * H:4 * H], w[..., 2 * H:3 * H]], axis=-1)


def atae_lstm_forward(context, aspect, len_x, params, *, batch_block=128):
    """Pallas implementation of ATAE_LSTM.forward (fully jittable)."""
    B, L = context.shape
    embedding = params["embedding"]
    E = embedding.shape[1]
    H = params["w_hh_t"].shape[0]
    P = params["w_dense_t"].shape[1]
    T = L                                      # static; no host sync on len_x
    Pp = 128                                   # lane-dense output width

    # Batch block: as large as the (padded) batch allows, but keep >= 2 blocks
    # when the batch permits so the "parallel" grid axis can shard across the
    # two v7x TensorCores.
    Bp8 = _round_up(max(B, 1), 8)
    BB = min(batch_block, Bp8)
    if Bp8 >= 16:
        BB = min(BB, max(8, (Bp8 // 2) // 8 * 8))
    Bp = _round_up(Bp8, BB)

    # glue: embedding lookup, batch padding, time-major transpose
    x_emb = jnp.take(embedding, context, axis=0)                 # (B, L, E)
    x_emb = jnp.pad(x_emb, ((0, Bp - B), (0, 0), (0, 0)))
    x_tm = jnp.transpose(x_emb, (1, 0, 2))                       # (T, Bp, E)

    asp = jnp.pad(aspect[:, 0, :], ((0, Bp - B), (0, 0)))        # (Bp, E)
    lens = jnp.pad(len_x.astype(jnp.int32), (0, Bp - B)).reshape(Bp, 1)
    max_len = jnp.max(len_x).astype(jnp.int32).reshape(1)

    # gate repack (i,f,g,o) -> (i,f,o,g)
    w_ih_x = _reorder_gates(params["w_ih_x_t"], H)
    w_ih_a = _reorder_gates(params["w_ih_a_t"], H)
    w_hh = _reorder_gates(params["w_hh_t"], H)
    b_lstm = _reorder_gates(params["b_lstm"], H)

    # hoist: aspect part of the input projection (constant over time / grid)
    gconst = asp @ w_ih_a + b_lstm                                # (Bp, 4H)

    # hoist + fold: the whole attention query path collapses to one H-vector.
    qx = params["q_param"] @ params["w_q_t"] + params["b_q"]      # (1, D)
    qw = qx @ params["att_w"]                                     # (1, D)
    v_att = qw @ params["w_k_h_t"].T                              # (1, H)

    # lane-pad the dense head
    w_d = jnp.pad(params["w_dense_t"], ((0, 0), (0, Pp - P)))
    b_d = jnp.pad(params["b_dense"], ((0, 0), (0, Pp - P)))

    in_specs = [
        pl.BlockSpec(memory_space=pltpu.MemorySpace.SMEM),        # max_len
        pl.BlockSpec((BB, 1), lambda g: (g, 0)),                  # lens
        pl.BlockSpec((T, BB, E), lambda g: (0, g, 0)),            # x (time-major)
        pl.BlockSpec((BB, 4 * H), lambda g: (g, 0)),              # gconst
        pl.BlockSpec((E, 4 * H), lambda g: (0, 0)),               # w_ih_x
        pl.BlockSpec((H, 4 * H), lambda g: (0, 0)),               # w_hh
        pl.BlockSpec((1, H), lambda g: (0, 0)),                   # v_att (folded)
        pl.BlockSpec((H, Pp), lambda g: (0, 0)),                  # w_dense (padded)
        pl.BlockSpec((1, Pp), lambda g: (0, 0)),                  # b_dense (padded)
    ]
    out_spec = pl.BlockSpec((BB, Pp), lambda g: (g, 0))

    # rough f32 VMEM residency: gx + h_all + double-buffered x block (+ slack).
    # For very long T this scratch should be time-chunked instead.
    vmem_est = 4 * T * BB * (4 * H + H + 2 * E) + (1 << 20)
    vmem_limit = int(min(64 << 20, max(32 << 20, 2 * vmem_est)))

    grid_spec = pltpu.PrefetchScalarGridSpec(
        num_scalar_prefetch=0,
        grid=(Bp // BB,),
        in_specs=in_specs,
        out_specs=out_spec,
        scratch_shapes=[pltpu.VMEM((T, BB, H), jnp.float32),
                        pltpu.VMEM((T, BB, 4 * H), jnp.float32),
                        pltpu.VMEM((BB, H), jnp.float32),
                        pltpu.VMEM((BB, H), jnp.float32)],
    )

    fn = pl.pallas_call(
        atae_lstm_kernel,
        out_shape=jax.ShapeDtypeStruct((Bp, Pp), jnp.float32),
        grid_spec=grid_spec,
        compiler_params=pltpu.CompilerParams(
            dimension_semantics=("parallel",),     # independent batch blocks
            vmem_limit_bytes=vmem_limit),
    )
    out = fn(max_len, lens, x_tm, gconst,
             w_ih_x, w_hh, v_att, w_d, b_d)
    return out[:B, :P]


def atae_lstm_reference(context, aspect, len_x, params):
    """Pure-JAX mirror of the PyTorch forward (for verification)."""
    embedding = params["embedding"]
    E = embedding.shape[1]
    H = params["w_hh_t"].shape[0]
    T = int(jnp.max(len_x))
    B = context.shape[0]

    x = jnp.take(embedding, context, axis=0)[:, :T, :]          # (B, T, E)
    asp = jnp.broadcast_to(aspect, (B, T, E))
    xa = jnp.concatenate([x, asp], axis=-1)                      # (B, T, 2E)

    W_ih = jnp.concatenate([params["w_ih_x_t"], params["w_ih_a_t"]], axis=0)
    W_hh = params["w_hh_t"]
    b = params["b_lstm"]

    def step(carry, inp):
        h, c = carry
        xt, valid = inp
        gates = xt @ W_ih + h @ W_hh + b
        i_g = jax.nn.sigmoid(gates[:, 0:H])
        f_g = jax.nn.sigmoid(gates[:, H:2 * H])
        g_g = jnp.tanh(gates[:, 2 * H:3 * H])
        o_g = jax.nn.sigmoid(gates[:, 3 * H:4 * H])
        c_new = f_g * c + i_g * g_g
        h_new = o_g * jnp.tanh(c_new)
        v = valid[:, None]
        h_out = jnp.where(v, h_new, 0.0)
        return (jnp.where(v, h_new, h), jnp.where(v, c_new, c)), h_out

    valid_mask = (jnp.arange(T)[None, :] < len_x[:, None])       # (B, T)
    xs = jnp.swapaxes(xa, 0, 1)
    vs = valid_mask.T
    (_, _), h_seq = lax.scan(step, (jnp.zeros((B, H)), jnp.zeros((B, H))),
                             (xs, vs))
    h = jnp.swapaxes(h_seq, 0, 1)                                # (B, T, H)

    ha = jnp.concatenate([h, asp], axis=-1)                      # (B, T, D)
    W_k = jnp.concatenate([params["w_k_h_t"], params["w_k_a_t"]], axis=0)
    kx = ha @ W_k + params["b_k"]                                # (B, T, D)
    qx = params["q_param"] @ params["w_q_t"] + params["b_q"]     # (1, D)
    qw = qx @ params["att_w"]                                    # (1, D)
    logits = jnp.einsum("btd,d->bt", kx, qw[0])
    score = jax.nn.softmax(logits, axis=-1)
    pooled = jnp.einsum("bt,bth->bh", score, h)
    return pooled @ params["w_dense_t"] + params["b_dense"]


def init_params(key, vocab, E, H, P):
    D = H + E
    ks = jax.random.split(key, 16)
    n = lambda k, s, sc=0.1: (jax.random.normal(k, s, jnp.float32) * sc)
    return {
        "embedding": n(ks[0], (vocab, E), 0.5),
        "w_ih_x_t": n(ks[1], (E, 4 * H)),     # first half of W_ih^T (word part)
        "w_ih_a_t": n(ks[2], (E, 4 * H)),     # second half (aspect part)
        "w_hh_t":   n(ks[3], (H, 4 * H)),
        "b_lstm":   n(ks[4], (1, 4 * H)),     # b_ih + b_hh combined
        "w_k_h_t":  n(ks[5], (H, D)),
        "w_k_a_t":  n(ks[6], (E, D)),
        "b_k":      n(ks[7], (1, D)),
        "w_q_t":    n(ks[8], (D, D)),
        "b_q":      n(ks[9], (1, D)),
        "q_param":  n(ks[10], (1, D)),
        "att_w":    n(ks[11], (D, D)),
        "w_dense_t": n(ks[12], (H, P)),
        "b_dense":  n(ks[13], (1, P)),
    }


if __name__ == "__main__":
    B, L, vocab = 2, 10, 50
    E, H, P = 32, 32, 3            # word_embed_dim, hidden_size, num_polar

    key = jax.random.PRNGKey(0)
    k_ctx, k_asp, k_par = jax.random.split(key, 3)

    context = jax.random.randint(k_ctx, (B, L), 0, vocab, dtype=jnp.int32)
    aspect = jax.random.normal(k_asp, (B, 1, E), jnp.float32) * 0.5
    len_x = jnp.array([8, 5], dtype=jnp.int32)

    params = init_params(k_par, vocab, E, H, P)

    out = jax.jit(atae_lstm_forward)(context, aspect, len_x, params)
    jax.block_until_ready(out)

    ref = atae_lstm_reference(context, aspect, len_x, params)
    if not bool(jnp.allclose(out, ref, rtol=2e-3, atol=2e-3)):
        raise AssertionError(f"mismatch vs reference:\n{out}\n{ref}")

    print("KERNEL_OK")
</pallas_src>

<mosaic_0001>
module attributes {stable_mosaic.version = 11 : i64} {
  func.func @atae_lstm_kernel(%arg0: i32, %arg1: memref<1xi32, #tpu.memory_space<smem>>, %arg2: memref<8x1xi32, #tpu.memory_space<vmem>>, %arg3: memref<10x8x32xf32, #tpu.memory_space<vmem>>, %arg4: memref<8x128xf32, #tpu.memory_space<vmem>>, %arg5: memref<32x128xf32, #tpu.memory_space<vmem>>, %arg6: memref<32x128xf32, #tpu.memory_space<vmem>>, %arg7: memref<1x32xf32, #tpu.memory_space<vmem>>, %arg8: memref<32x128xf32, #tpu.memory_space<vmem>>, %arg9: memref<1x128xf32, #tpu.memory_space<vmem>>, %arg10: memref<8x128xf32, #tpu.memory_space<vmem>>, %arg11: memref<10x8x32xf32, #tpu.memory_space<vmem>>, %arg12: memref<10x8x128xf32, #tpu.memory_space<vmem>>, %arg13: memref<8x32xf32, #tpu.memory_space<vmem>>, %arg14: memref<8x32xf32, #tpu.memory_space<vmem>>) attributes {dimension_semantics = [#tpu.dimension_semantics<parallel>], iteration_bounds = array<i64: 1>, scalar_prefetch = 0 : i64, scratch_operands = 4 : i64, tpu.core_type = #tpu.core_type<tc>, window_params = [{transform_indices = @transform_0, window_bounds = array<i64: 1>}, {transform_indices = @transform_1, window_bounds = array<i64: 8, 1>}, {transform_indices = @transform_2, window_bounds = array<i64: 10, 8, 32>}, {transform_indices = @transform_3, window_bounds = array<i64: 8, 128>}, {pipeline_mode = #tpu.pipeline_mode<synchronous>, transform_indices = @transform_4, window_bounds = array<i64: 32, 128>}, {pipeline_mode = #tpu.pipeline_mode<synchronous>, transform_indices = @transform_5, window_bounds = array<i64: 32, 128>}, {pipeline_mode = #tpu.pipeline_mode<synchronous>, transform_indices = @transform_6, window_bounds = array<i64: 1, 32>}, {pipeline_mode = #tpu.pipeline_mode<synchronous>, transform_indices = @transform_7, window_bounds = array<i64: 32, 128>}, {pipeline_mode = #tpu.pipeline_mode<synchronous>, transform_indices = @transform_8, window_bounds = array<i64: 1, 128>}, {transform_indices = @transform_9, window_bounds = array<i64: 8, 128>}]} {
    %c0 = arith.constant 0 : index
    %c0_0 = arith.constant 0 : index
    %0 = vector.load %arg2[%c0, %c0_0] : memref<8x1xi32, #tpu.memory_space<vmem>>, vector<8x1xi32>
    %c0_1 = arith.constant 0 : index
    %c0_2 = arith.constant 0 : index
    %1 = vector.load %arg6[%c0_1, %c0_2] : memref<32x128xf32, #tpu.memory_space<vmem>>, vector<32x128xf32>
    %c0_3 = arith.constant 0 : index
    %2 = memref.load %arg1[%c0_3] : memref<1xi32, #tpu.memory_space<smem>>
    %cst = arith.constant 0.000000e+00 : f32
    %3 = vector.broadcast %cst : f32 to vector<10x8x32xf32>
    %c0_4 = arith.constant 0 : index
    %c0_5 = arith.constant 0 : index
    %c0_6 = arith.constant 0 : index
    %4 = vector.load %arg11[%c0_4, %c0_5, %c0_6] : memref<10x8x32xf32, #tpu.memory_space<vmem>>, vector<10x8x32xf32>
    tpu.vector_store %arg11[%c0_4, %c0_5, %c0_6], %3 {strides = array<i32>} : memref<10x8x32xf32, #tpu.memory_space<vmem>>, vector<10x8x32xf32>,
    %cst_7 = arith.constant 0.000000e+00 : f32
    %5 = vector.broadcast %cst_7 : f32 to vector<8x32xf32>
    %c0_8 = arith.constant 0 : index
    %c0_9 = arith.constant 0 : index
    %6 = vector.load %arg13[%c0_8, %c0_9] : memref<8x32xf32, #tpu.memory_space<vmem>>, vector<8x32xf32>
    tpu.vector_store %arg13[%c0_8, %c0_9], %5 {strides = array<i32>} : memref<8x32xf32, #tpu.memory_space<vmem>>, vector<8x32xf32>,
    %cst_10 = arith.constant 0.000000e+00 : f32
    %7 = vector.broadcast %cst_10 : f32 to vector<8x32xf32>
    %c0_11 = arith.constant 0 : index
    %c0_12 = arith.constant 0 : index
    %8 = vector.load %arg14[%c0_11, %c0_12] : memref<8x32xf32, #tpu.memory_space<vmem>>, vector<8x32xf32>
    tpu.vector_store %arg14[%c0_11, %c0_12], %7 {strides = array<i32>} : memref<8x32xf32, #tpu.memory_space<vmem>>, vector<8x32xf32>,
    %c0_13 = arith.constant 0 : index
    %c0_14 = arith.constant 0 : index
    %c0_15 = arith.constant 0 : index
    %9 = vector.load %arg3[%c0_13, %c0_14, %c0_15] : memref<10x8x32xf32, #tpu.memory_space<vmem>>, vector<10x8x32xf32>
    %10 = vector.shape_cast %9 : vector<10x8x32xf32> to vector<80x32xf32>
    %c0_16 = arith.constant 0 : index
    %c0_17 = arith.constant 0 : index
    %11 = vector.load %arg5[%c0_16, %c0_17] : memref<32x128xf32, #tpu.memory_space<vmem>>, vector<32x128xf32>
    %cst_18 = arith.constant dense<0.000000e+00> : vector<80x128xf32>
    %12 = tpu.matmul %10, %11, %cst_18 {dimension_numbers = #tpu.dot_dimension_numbers<[1], [0], [0], [1], [0, 0, 1, 1], [], []>} : vector<80x32xf32>, vector<32x128xf32>, vector<80x128xf32> -> vector<80x128xf32>
    %13 = vector.shape_cast %12 : vector<80x128xf32> to vector<10x8x128xf32>
    %c0_19 = arith.constant 0 : index
    %c0_20 = arith.constant 0 : index
    %14 = vector.load %arg4[%c0_19, %c0_20] : memref<8x128xf32, #tpu.memory_space<vmem>>, vector<8x128xf32>
    %15 = vector.shape_cast %14 : vector<8x128xf32> to vector<1x8x128xf32>
    %16 = vector.broadcast %15 : vector<1x8x128xf32> to vector<10x8x128xf32>
    %17 = arith.addf %13, %16 : vector<10x8x128xf32>
    %c0_21 = arith.constant 0 : index
    %c0_22 = arith.constant 0 : index
    %c0_23 = arith.constant 0 : index
    %18 = vector.load %arg12[%c0_21, %c0_22, %c0_23] : memref<10x8x128xf32, #tpu.memory_space<vmem>>, vector<10x8x128xf32>
    tpu.vector_store %arg12[%c0_21, %c0_22, %c0_23], %17 {strides = array<i32>} : memref<10x8x128xf32, #tpu.memory_space<vmem>>, vector<10x8x128xf32>,
    %c0_i32 = arith.constant 0 : i32
    %19 = arith.subi %2, %c0_i32 : i32
    %c1_i32 = arith.constant 1 : i32
    %c1_i32_24 = arith.constant 1 : i32
    %20 = arith.subi %c1_i32, %c1_i32_24 : i32
    %21 = arith.addi %19, %20 : i32
    %c1_i32_25 = arith.constant 1 : i32
    %22 = arith.divsi %21, %c1_i32_25 : i32
    %c1_i32_26 = arith.constant 1 : i32
    %c0_i32_27 = arith.constant 0 : i32
    %c0_i32_28 = arith.constant 0 : i32
    %23 = arith.subi %22, %c0_i32_28 : i32
    %24 = arith.addi %c0_i32_28, %23 : i32
    %c1_i32_29 = arith.constant 1 : i32
    scf.for %arg15 = %c0_i32_28 to %24 step %c1_i32_29  : i32 {
      %55 = arith.muli %arg15, %c1_i32_26 : i32
      %56 = arith.addi %c0_i32_27, %55 : i32
      %c0_47 = arith.constant 0 : index
      %c0_48 = arith.constant 0 : index
      %57 = vector.load %arg13[%c0_47, %c0_48] : memref<8x32xf32, #tpu.memory_space<vmem>>, vector<8x32xf32>
      %c0_49 = arith.constant 0 : index
      %c0_50 = arith.constant 0 : index
      %58 = vector.load %arg14[%c0_49, %c0_50] : memref<8x32xf32, #tpu.memory_space<vmem>>, vector<8x32xf32>
      %59 = arith.index_cast %56 : i32 to index
      %c0_51 = arith.constant 0 : index
      %c0_52 = arith.constant 0 : index
      %60 = vector.load %arg12[%59, %c0_51, %c0_52] : memref<10x8x128xf32, #tpu.memory_space<vmem>>, vector<1x8x128xf32>
      %61 = vector.shape_cast %60 : vector<1x8x128xf32> to vector<8x128xf32>
      %cst_53 = arith.constant dense<0.000000e+00> : vector<8x128xf32>
      %62 = tpu.matmul %57, %1, %cst_53 {dimension_numbers = #tpu.dot_dimension_numbers<[1], [0], [0], [1], [0, 0, 1, 1], [], []>} : vector<8x32xf32>, vector<32x128xf32>, vector<8x128xf32> -> vector<8x128xf32>
      %63 = arith.addf %61, %62 : vector<8x128xf32>
      %64 = arith.negf %63 : vector<8x128xf32>
      %65 = math.exp %64 : vector<8x128xf32>
      %cst_54 = arith.constant 1.000000e+00 : f32
      %66 = vector.broadcast %cst_54 : f32 to vector<8x128xf32>
      %67 = arith.addf %66, %65 : vector<8x128xf32>
      %68 = arith.divf %66, %67 : vector<8x128xf32>
      %69 = math.tanh %63 : vector<8x128xf32>
      %70 = vector.extract_strided_slice %68 {offsets = [0, 0], sizes = [8, 32], strides = [1, 1]} : vector<8x128xf32> to vector<8x32xf32>
      %71 = vector.extract_strided_slice %68 {offsets = [0, 32], sizes = [8, 32], strides = [1, 1]} : vector<8x128xf32> to vector<8x32xf32>
      %72 = vector.extract_strided_slice %68 {offsets = [0, 64], sizes = [8, 32], strides = [1, 1]} : vector<8x128xf32> to vector<8x32xf32>
      %73 = vector.extract_strided_slice %69 {offsets = [0, 96], sizes = [8, 32], strides = [1, 1]} : vector<8x128xf32> to vector<8x32xf32>
      %74 = arith.mulf %71, %58 : vector<8x32xf32>
      %75 = arith.mulf %70, %73 : vector<8x32xf32>
      %76 = arith.addf %74, %75 : vector<8x32xf32>
      %77 = math.tanh %76 : vector<8x32xf32>
      %78 = arith.mulf %72, %77 : vector<8x32xf32>
      %79 = vector.broadcast %56 : i32 to vector<8x1xi32>
      %80 = arith.cmpi slt, %79, %0 : vector<8x1xi32>
      %cst_55 = arith.constant 0.000000e+00 : f32
      %81 = vector.shape_cast %80 : vector<8x1xi1> to vector<8x1xi1>
      %82 = vector.broadcast %81 : vector<8x1xi1> to vector<8x32xi1>
      %83 = vector.broadcast %cst_55 : f32 to vector<8x32xf32>
      %84 = arith.select %82, %78, %83 : vector<8x32xi1>, vector<8x32xf32>
      %85 = arith.index_cast %56 : i32 to index
      %c0_56 = arith.constant 0 : index
      %c0_57 = arith.constant 0 : index
      %86 = vector.load %arg11[%85, %c0_56, %c0_57] : memref<10x8x32xf32, #tpu.memory_space<vmem>>, vector<1x8x32xf32>
      %87 = vector.shape_cast %86 : vector<1x8x32xf32> to vector<8x32xf32>
      %88 = vector.shape_cast %84 : vector<8x32xf32> to vector<1x8x32xf32>
      tpu.vector_store %arg11[%85, %c0_56, %c0_57], %88 {strides = array<i32>} : memref<10x8x32xf32, #tpu.memory_space<vmem>>, vector<1x8x32xf32>,
      %89 = vector.shape_cast %80 : vector<8x1xi1> to vector<8x1xi1>
      %90 = vector.broadcast %89 : vector<8x1xi1> to vector<8x32xi1>
      %91 = arith.select %90, %78, %57 : vector<8x32xi1>, vector<8x32xf32>
      %c0_58 = arith.constant 0 : index
      %c0_59 = arith.constant 0 : index
      %92 = vector.load %arg13[%c0_58, %c0_59] : memref<8x32xf32, #tpu.memory_space<vmem>>, vector<8x32xf32>
      tpu.vector_store %arg13[%c0_58, %c0_59], %91 {strides = array<i32>} : memref<8x32xf32, #tpu.memory_space<vmem>>, vector<8x32xf32>,
      %93 = vector.shape_cast %80 : vector<8x1xi1> to vector<8x1xi1>
      %94 = vector.broadcast %93 : vector<8x1xi1> to vector<8x32xi1>
      %95 = arith.select %94, %76, %58 : vector<8x32xi1>, vector<8x32xf32>
      %c0_60 = arith.constant 0 : index
      %c0_61 = arith.constant 0 : index
      %96 = vector.load %arg14[%c0_60, %c0_61] : memref<8x32xf32, #tpu.memory_space<vmem>>, vector<8x32xf32>
      tpu.vector_store %arg14[%c0_60, %c0_61], %95 {strides = array<i32>} : memref<8x32xf32, #tpu.memory_space<vmem>>, vector<8x32xf32>,
    }
    %c0_30 = arith.constant 0 : index
    %c0_31 = arith.constant 0 : index
    %c0_32 = arith.constant 0 : index
    %25 = vector.load %arg11[%c0_30, %c0_31, %c0_32] : memref<10x8x32xf32, #tpu.memory_space<vmem>>, vector<10x8x32xf32>
    %c0_33 = arith.constant 0 : index
    %c0_34 = arith.constant 0 : index
    %26 = vector.load %arg7[%c0_33, %c0_34] : memref<1x32xf32, #tpu.memory_space<vmem>>, vector<1x32xf32>
    %27 = vector.shape_cast %26 : vector<1x32xf32> to vector<1x1x32xf32>
    %28 = vector.broadcast %27 : vector<1x1x32xf32> to vector<10x8x32xf32>
    %29 = arith.mulf %25, %28 : vector<10x8x32xf32>
    %cst_35 = arith.constant dense<0.000000e+00> : vector<10x8xf32>
    %30 = vector.multi_reduction <add>, %29, %cst_35 [2] : vector<10x8x32xf32> to vector<10x8xf32>
    %31 = vector.shape_cast %30 : vector<10x8xf32> to vector<10x8x1xf32>
    %32 = tpu.iota {dimensions = array<i32: 0>} : vector<10x8x1xi32>
    %33 = vector.broadcast %2 : i32 to vector<10x8x1xi32>
    %34 = arith.cmpi slt, %32, %33 : vector<10x8x1xi32>
    %cst_36 = arith.constant -1.000000e+30 : f32
    %35 = vector.broadcast %cst_36 : f32 to vector<10x8x1xf32>
    %36 = arith.select %34, %31, %35 : vector<10x8x1xi1>, vector<10x8x1xf32>
    %cst_37 = arith.constant dense<0xFF800000> : vector<8x1xf32>
    %37 = vector.multi_reduction <maximumf>, %36, %cst_37 [0] : vector<10x8x1xf32> to vector<8x1xf32>
    %38 = vector.shape_cast %37 : vector<8x1xf32> to vector<1x8x1xf32>
    %39 = vector.broadcast %38 : vector<1x8x1xf32> to vector<10x8x1xf32>
    %40 = arith.subf %36, %39 : vector<10x8x1xf32>
    %41 = math.exp %40 : vector<10x8x1xf32>
    %cst_38 = arith.constant dense<0.000000e+00> : vector<8x1xf32>
    %42 = vector.multi_reduction <add>, %41, %cst_38 [0] : vector<10x8x1xf32> to vector<8x1xf32>
    %43 = vector.shape_cast %42 : vector<8x1xf32> to vector<1x8x1xf32>
    %44 = vector.broadcast %43 : vector<1x8x1xf32> to vector<10x8x1xf32>
    %45 = arith.divf %41, %44 : vector<10x8x1xf32>
    %46 = vector.broadcast %45 : vector<10x8x1xf32> to vector<10x8x32xf32>
    %47 = arith.mulf %46, %25 : vector<10x8x32xf32>
    %cst_39 = arith.constant dense<0.000000e+00> : vector<8x32xf32>
    %48 = vector.multi_reduction <add>, %47, %cst_39 [0] : vector<10x8x32xf32> to vector<8x32xf32>
    %c0_40 = arith.constant 0 : index
    %c0_41 = arith.constant 0 : index
    %49 = vector.load %arg8[%c0_40, %c0_41] : memref<32x128xf32, #tpu.memory_space<vmem>>, vector<32x128xf32>
    %cst_42 = arith.constant dense<0.000000e+00> : vector<8x128xf32>
    %50 = tpu.matmul %48, %49, %cst_42 {dimension_numbers = #tpu.dot_dimension_numbers<[1], [0], [0], [1], [0, 0, 1, 1], [], []>} : vector<8x32xf32>, vector<32x128xf32>, vector<8x128xf32> -> vector<8x128xf32>
    %c0_43 = arith.constant 0 : index
    %c0_44 = arith.constant 0 : index
    %51 = vector.load %arg9[%c0_43, %c0_44] : memref<1x128xf32, #tpu.memory_space<vmem>>, vector<1x128xf32>
    %52 = vector.broadcast %51 : vector<1x128xf32> to vector<8x128xf32>
    %53 = arith.addf %50, %52 : vector<8x128xf32>
    %c0_45 = arith.constant 0 : index
    %c0_46 = arith.constant 0 : index
    %54 = vector.load %arg10[%c0_45, %c0_46] : memref<8x128xf32, #tpu.memory_space<vmem>>, vector<8x128xf32>
    tpu.vector_store %arg10[%c0_45, %c0_46], %53 {strides = array<i32>} : memref<8x128xf32, #tpu.memory_space<vmem>>, vector<8x128xf32>,
    return
  }
  func.func @transform_0(%arg0: i32) -> i32 {
    %c0_i32 = arith.constant 0 : i32
    %c0_i32_0 = arith.constant 0 : i32
    return %c0_i32 : i32
  }
  func.func @transform_1(%arg0: i32) -> (i32, i32) {
    %c0_i32 = arith.constant 0 : i32
    %c0_i32_0 = arith.constant 0 : i32
    return %arg0, %c0_i32 : i32, i32
  }
  func.func @transform_2(%arg0: i32) -> (i32, i32, i32) {
    %c0_i32 = arith.constant 0 : i32
    %c0_i32_0 = arith.constant 0 : i32
    %c0_i32_1 = arith.constant 0 : i32
    return %c0_i32, %arg0, %c0_i32_0 : i32, i32, i32
  }
  func.func @transform_3(%arg0: i32) -> (i32, i32) {
    %c0_i32 = arith.constant 0 : i32
    %c0_i32_0 = arith.constant 0 : i32
    return %arg0, %c0_i32 : i32, i32
  }
  func.func @transform_4(%arg0: i32) -> (i32, i32) {
    %c0_i32 = arith.constant 0 : i32
    %c0_i32_0 = arith.constant 0 : i32
    %c0_i32_1 = arith.constant 0 : i32
    return %c0_i32, %c0_i32_0 : i32, i32
  }
  func.func @transform_5(%arg0: i32) -> (i32, i32) {
    %c0_i32 = arith.constant 0 : i32
    %c0_i32_0 = arith.constant 0 : i32
    %c0_i32_1 = arith.constant 0 : i32
    return %c0_i32, %c0_i32_0 : i32, i32
  }
  func.func @transform_6(%arg0: i32) -> (i32, i32) {
    %c0_i32 = arith.constant 0 : i32
    %c0_i32_0 = arith.constant 0 : i32
    %c0_i32_1 = arith.constant 0 : i32
    return %c0_i32, %c0_i32_0 : i32, i32
  }
  func.func @transform_7(%arg0: i32) -> (i32, i32) {
    %c0_i32 = arith.constant 0 : i32
    %c0_i32_0 = arith.constant 0 : i32
    %c0_i32_1 = arith.constant 0 : i32
    return %c0_i32, %c0_i32_0 : i32, i32
  }
  func.func @transform_8(%arg0: i32) -> (i32, i32) {
    %c0_i32 = arith.constant 0 : i32
    %c0_i32_0 = arith.constant 0 : i32
    %c0_i32_1 = arith.constant 0 : i32
    return %c0_i32, %c0_i32_0 : i32, i32
  }
  func.func @transform_9(%arg0: i32) -> (i32, i32) {
    %c0_i32 = arith.constant 0 : i32
    %c0_i32_0 = arith.constant 0 : i32
    return %arg0, %c0_i32 : i32, i32
  }
}

</mosaic_0001>

<bundles_post_ra>
// kernel: atae_lstm_forward.1
= control target key start
LH: loop header
LB: loop body
LE: loop exit
PB: predicated region body
PF: predicated region fallthrough
CT: control target
= control target key end

     0   :  { %vm39_vm0 = vcmask 261120   ;;  %v806_v3 = vmov 0.0   ;;  %s1085_s0 = inlined_call_operand.<no memory space> [shape: s32[1], index: 0, kind: input, shape index: {}]   ;;  %s1086_s1 = inlined_call_operand.vmem [shape: s32[8,1], index: 1, kind: input, shape index: {}]   ;;  %s1087_s4 = inlined_call_operand.vmem [shape: f32[32,128], index: 4, kind: input, shape index: {}]   ;;  %s1088_s5 = inlined_call_operand.vmem [shape: f32[32,128], index: 5, kind: input, shape index: {}]   ;;  %s1089_s6 = inlined_call_operand.vmem [shape: f32[1,32], index: 6, kind: input, shape index: {}]   ;;  %s1090_s7 = inlined_call_operand.vmem [shape: f32[32,128], index: 7, kind: input, shape index: {}]   ;;  %s1091_s8 = inlined_call_operand.vmem [shape: f32[1,128], index: 8, kind: input, shape index: {}]   ;;  %s1092_s9 = inlined_call_operand.vmem [shape: f32[8,128], index: 9, kind: output, shape index: {}]   ;;  %s1093_s2 = inlined_call_operand.vmem [shape: f32[10,8,32], index: 2, kind: input, shape index: {}]   ;;  %s1094_s3 = inlined_call_operand.vmem [shape: f32[8,128], index: 3, kind: input, shape index: {}]  }
   0x1   :  { %v869_v0 = vld [vmem:[%s1086_s1] sm:$0xff]  ;;  %v879_v2 = vld [vmem:[%s1088_s5 + $0x8] sm:$0xff]  ;;  %40 = vst.msk [vmem:[#allocation2] sm:$0xff] %vm39_vm0, %v806_v3  ;;  %41 = vst.msk [vmem:[#allocation2 + $0x8] sm:$0xff] %vm39_vm0, %v806_v3  ;;  %p648_p0 = scmp.le.s32.totalorder %s1085_s0, 0 }
   0x2   :  { %v874_v1 = vld [vmem:[%s1088_s5] sm:$0xff]  ;;  %42 = vst.msk [vmem:[#allocation2 + $0x10] sm:$0xff] %vm39_vm0, %v806_v3  ;;  %43 = vst.msk [vmem:[#allocation2 + $0x18] sm:$0xff] %vm39_vm0, %v806_v3  ;;  %v908_v4 = vld [vmem:[%s1088_s5 + $0x10] sm:$0xff]  ;;  %s973_s24 = smov (!%p648_p0), 0  }
   0x3   :  { %44 = vst.msk [vmem:[#allocation2 + $0x20] sm:$0xff] %vm39_vm0, %v806_v3  ;;  %45 = vst.msk [vmem:[#allocation2 + $0x28] sm:$0xff] %vm39_vm0, %v806_v3  ;;  %v913_v5 = vld [vmem:[%s1088_s5 + $0x18] sm:$0xff]  ;;  %v62_v6 = vld [vmem:[%s1087_s4] sm:$0xff] }
   0x4   :  { %46 = vst.msk [vmem:[#allocation2 + $0x30] sm:$0xff] %vm39_vm0, %v806_v3  ;;  %47 = vst.msk [vmem:[#allocation2 + $0x38] sm:$0xff] %vm39_vm0, %v806_v3  ;;  %v63_v7 = vld [vmem:[%s1087_s4 + $0x8] sm:$0xff]  ;;  %v64_v8 = vld [vmem:[%s1087_s4 + $0x10] sm:$0xff] }
   0x5   :  { %48 = vst.msk [vmem:[#allocation2 + $0x40] sm:$0xff] %vm39_vm0, %v806_v3  ;;  %49 = vst.msk [vmem:[#allocation2 + $0x48] sm:$0xff] %vm39_vm0, %v806_v3  ;;  %v65_v9 = vld [vmem:[%s1087_s4 + $0x18] sm:$0xff]  ;;  %v724_v10 = vpack.c.bf16 %v63_v7, %v62_v6  ;;  %v52_v12 = vld [vmem:[%s1093_s2] sm:$0xff] }
   0x6   :  { %50 = vst.msk [vmem:[#allocation4] sm:$0xff] %vm39_vm0, %v806_v3  ;;  %51 = vst.msk [vmem:[#allocation5] sm:$0xff] %vm39_vm0, %v806_v3  ;;  %v728_v11 = vpack.c.bf16 %v65_v9, %v64_v8  ;;  %v58_v13 = vld [vmem:[%s1093_s2 + $0x30] sm:$0xff]  ;;  %687 = vmatprep.mubr.msk.f32.mxu0 %vm39_vm0, %v52_v12  ;;  %v53_v14 = vld [vmem:[%s1093_s2 + $0x8] sm:$0xff] }
   0x7   :  { %696 = vmatprep.mubr.msk.f32.mxu1 %vm39_vm0, %v58_v13  ;;  %725 = vmatprep.subr.bf16.mxu0 %v724_v10  ;;  %v59_v15 = vld [vmem:[%s1093_s2 + $0x38] sm:$0xff]  ;;  %v54_v16 = vld [vmem:[%s1093_s2 + $0x10] sm:$0xff]  ;;  %v60_v17 = vld [vmem:[%s1093_s2 + $0x40] sm:$0xff] }
   0x8   :  { %744 = vmatprep.subr.bf16.mxu1 %v724_v10  ;;  %727 = vmatpush3.bf16.msra.mxu0 %v724_v10  ;;  %v55_v18 = vld [vmem:[%s1093_s2 + $0x18] sm:$0xff]  ;;  %v61_v19 = vld [vmem:[%s1093_s2 + $0x48] sm:$0xff]  ;;  %v56_v20 = vld [vmem:[%s1093_s2 + $0x20] sm:$0xff] }
   0x9   :  { %746 = vmatpush3.bf16.msra.mxu1 %v724_v10  ;;  %729 = vmatprep.subr.bf16.mxu0 %v728_v11  ;;  %v57_v21 = vld [vmem:[%s1093_s2 + $0x28] sm:$0xff]  ;;  %v211_v22 = vld [vmem:[%s1094_s3] sm:$0xff] }
   0xa   :  { %745 = vmatprep.subr.bf16.mxu1 %v728_v11 }
   0xc   :  { %731 = vmatpush3.bf16.msra.mxu0 %v728_v11 }
   0xd   :  { %747 = vmatpush3.bf16.msra.mxu1 %v728_v11 }
   0xf   :  { %688 = vmatmul.mubr.msk.f32.vlgmr.msra.gmra.mrb[0].mxu0 %vm39_vm0, %v53_v14 }
  0x10   :  { %697 = vmatmul.mubr.msk.f32.vlgmr.msra.gmra.mrb[0].mxu1 %vm39_vm0, %v59_v15  ;;  %690 = vmatprep.mubr.msk.f32.mxu0 %vm39_vm0, %v54_v16 }
  0x11   :  { %699 = vmatprep.mubr.msk.f32.mxu1 %vm39_vm0, %v60_v17 }
  0x13   :  { %691 = vmatmul.mubr.msk.f32.gmra.mrb[2].mxu0 %vm39_vm0, %v55_v18 }
  0x14   :  { %700 = vmatmul.mubr.msk.f32.gmra.mrb[2].mxu1 %vm39_vm0, %v61_v19  ;;  %693 = vmatprep.mubr.msk.f32.mxu0 %vm39_vm0, %v56_v20 }
  0x17   :  { %694 = vmatmul.mubr.msk.f32.gmra.mrb[4].mxu0 %vm39_vm0, %v57_v21 }
  0xe2   :  { %v689_v23 = vpop.f32.mrb[0].mxu0 }
  0xe3   :  { %v698_v24 = vpop.f32.mrb[0].mxu1  ;;  %v213_v25 = vadd.f32 %v689_v23, %v211_v22  ;;  %v162_v26 = vpop.f32.mrb[1].mxu0 }
  0xe4   :  { %v219_v27 = vadd.f32 %v698_v24, %v211_v22  ;;  %v192_v28 = vpop.f32.mrb[1].mxu1  ;;  %v212_v29 = vadd.f32 %v211_v22, %v162_v26 }
  0xe5   :  { %v218_v30 = vadd.f32 %v211_v22, %v192_v28  ;;  %223 = vst [vmem:[#allocation3 + $0x8] sm:$0xff] %v213_v25 }
  0xe6   :  { %229 = vst [vmem:[#allocation3 + $0x38] sm:$0xff] %v219_v27  ;;  %222 = vst [vmem:[#allocation3] sm:$0xff] %v212_v29  ;;  %v692_v31 = vpop.f32.mrb[2].mxu0 }
  0xe7   :  { %228 = vst [vmem:[#allocation3 + $0x30] sm:$0xff] %v218_v30  ;;  %v701_v32 = vpop.f32.mrb[2].mxu1  ;;  %v215_v33 = vadd.f32 %v692_v31, %v211_v22  ;;  %v172_v34 = vpop.f32.mrb[3].mxu0 }
  0xe8   :  { %v221_v35 = vadd.f32 %v701_v32, %v211_v22  ;;  %v202_v36 = vpop.f32.mrb[3].mxu1  ;;  %v214_v37 = vadd.f32 %v211_v22, %v172_v34  ;;  %635 = sbr.rel (%p648_p0) target bundleno = 956 (0x3bc), region = 59 }
  0xe9   :  { %v220_v38 = vadd.f32 %v211_v22, %v202_v36  ;;  %225 = vst [vmem:[#allocation3 + $0x18] sm:$0xff] %v215_v33 }
  0xea   :  { %231 = vst [vmem:[#allocation3 + $0x48] sm:$0xff] %v221_v35  ;;  %224 = vst [vmem:[#allocation3 + $0x10] sm:$0xff] %v214_v37  ;;  %v695_v39 = vpop.f32.mrb[4].mxu0 }
  0xeb   :  { %230 = vst [vmem:[#allocation3 + $0x40] sm:$0xff] %v220_v38  ;;  %v217_v40 = vadd.f32 %v695_v39, %v211_v22  ;;  %v182_v41 = vpop.f32.mrb[5].mxu0 }
  0xec   :  { %v216_v42 = vadd.f32 %v211_v22, %v182_v41 }
  0xed   :  { %227 = vst [vmem:[#allocation3 + $0x28] sm:$0xff] %v217_v40 }
  0xee   :  { %226 = vst [vmem:[#allocation3 + $0x20] sm:$0xff] %v216_v42 }
  0xef LB: > { %v733_v43 = vpack.c.bf16 %v879_v2, %v874_v1  ;;  %v807_v44 = vmov 0.0|0.0   ;;  %v736_v45 = vpack.c.bf16 %v913_v5, %v908_v4  ;;  %vm808_vm1 = vmmov 0   ;;  %v238_v47 = vld [vmem:[#allocation4] sm:$0xff]  ;;  %s649_s25 = sshll.u32 %s804_s24, 3  ;;  %s811_s26 = smov 32   ;;  %v239_v54 = vld [vmem:[#allocation5] sm:$0xff]  ;;  %s804_s24 = sphi %s973_s24, %s235_s24  }
  0xf0   : > { %732 = vmatprep.subr.bf16.mxu0 %v807_v44  ;;  %v809_v46 = vmov 0.0   ;;  %s241_s5 = scalar_lea.vmem [#allocation3], %s649_s25  ;;  %v810_v52 = vmov 0   ;;  %v345_v58 = vstv %s804_s24  ;;  %s812_s27 = smov 64  }
  0xf1   : > { %734 = vmatpush3.bf16.msra.mxu0 %v733_v43  ;;  %710 = vmatprep.mubr.msk.f32.mxu0 %vm808_vm1, %v809_v46  ;;  %vm346_vm2 = vcmp.lt.s32.totalorder %v345_v58, %v869_v0  ;;  %s813_s28 = smov 96   ;;  %s357_s4 = scalar_lea.vmem [#allocation2], %s649_s25 }
  0xf2   : > { %735 = vmatprep.subr.bf16.mxu0 %v807_v44  ;;  %766 = vset.pattern.permute.xlu1 %v810_v52  ;;  %v347_v62 = vsel %vm346_vm2, 1, %v810_v52  ;;  %s235_s24 = sadd.s32 1, %s804_s24  }
  0xf3   : > { %767 = vset.pattern.permute.xlu0 %v810_v52  ;;  %p234_p1 = scmp.ge.s32.totalorder %s235_s24, %s1085_s0 }
  0xf5   : > { %737 = vmatpush3.bf16.msra.mxu0 %v736_v45  ;;  %v242_v48 = vld [vmem:[%s241_s5] sm:$0xff] }
  0xf8   : > { %711 = vmatmul.mubr.msk.f32.vlgmr.msra.gmra.mrb[0].mxu0 %vm39_vm0, %v238_v47 }
 0x1cb   : > { %v312_v49 = vpop.f32.mrb[0].mxu0 }
 0x1cc   : > { %v316_v50 = vadd.f32 %v312_v49, %v242_v48  ;;  %v712_v51 = vpop.f32.mrb[1].mxu0 }
 0x1ce   : > { %768 = vtanh.f32 %v316_v50  ;;  %v651_v55 = vmul.f32 -1.442695, %v316_v50 }
 0x1d0   : > { %770 = vpow2.f32 %v651_v55 }
 0x1d8   : > { %v769_v53 = vpop.eup %768 }
 0x1d9   : > { %330 = vrot.lane.b32.xlu0 %v769_v53, %s811_s26 }
 0x1da   : > { %v771_v56 = vpop.eup %770 }
 0x1db   : > { %v320_v57 = vadd.f32 1.0, %v771_v56 }
 0x1dd   : > { %325 = vrot.lane.b32.xlu0 %v239_v54, %s811_s26  ;;  %772 = vrcp.f32 %v320_v57 }
 0x1e7   : > { %v773_v59 = vpop.eup %772 }
 0x24b   : > { %v331_v60 = vpop.permute.xlu0 %330 }
 0x24c   : > { %v333_v61 = vmul.f32 %v773_v59, %v331_v60 }
 0x24e   : > { %335 = vrot.lane.b32.xlu1 %v333_v61, %s811_s26 }
 0x24f   : > { %v326_v63 = vpop.permute.xlu0 %325 }
 0x250   : > { %v328_v6 = vmul.f32 %v773_v59, %v326_v63 }
 0x252   : > { %349 = vperm.xlu1 %766, %v347_v62  }
 0x256   : > { %359 = vrot.lane.b32.xlu1 %v238_v47, %s812_s27 }
 0x2c0   : > { %v336_v7 = vpop.permute.xlu1 %335 }
 0x2c1   : > { %v338_v8 = vadd.f32 %v336_v7, %v328_v6 }
 0x2c3   : > { %774 = vtanh.f32 %v338_v8 }
 0x2cd   : > { %v775_v9 = vpop.eup %774 }
 0x2ce   : > { %341 = vrot.lane.b32.xlu0 %v775_v9, %s811_s26 }
 0x2d1   : > { %v350_v10 = vpop.permute.xlu1 %349 }
 0x2d2   : > { %vm351_vm3 = vcmp.eq.s32.totalorder %v350_v10, 1 }
 0x2d3   : > { %v368_v16 = vsel %vm351_vm3, %v338_v8, %v326_v63 }
 0x2d5   : > { %v360_v12 = vpop.permute.xlu1 %359 }
 0x340   : > { %v342_v11 = vpop.permute.xlu0 %341 }
 0x341   : > { %v344_v13 = vmul.f32 %v773_v59, %v342_v11 }
 0x343   : > { %v362_v14 = vsel %vm351_vm3, %v344_v13, %v360_v12  ;;  %v352_v15 = vsel %vm351_vm3, %v344_v13, 0.0 }
 0x344   : > { %364 = vrot.lane.b32.xlu1 %v362_v14, %s812_s27  ;;  %354 = vrot.lane.b32.xlu0 %v352_v15, %s812_s27 }
 0x348   : > { %370 = vrot.lane.b32.xlu0 %v368_v16, %s813_s28 }
 0x3b5   :  { %237 = sbr.rel (!%p234_p1) target bundleno = 239 (0xef), region = 65 }
 0x3b6   : > { %v365_v17 = vpop.permute.xlu1 %364  ;;  %v355_v18 = vpop.permute.xlu0 %354 }
 0x3b7   : > { %367 = vst.msk [vmem:[#allocation4] sm:$0xff] %vm39_vm0, %v365_v17  ;;  %358 = vst.msk [vmem:[%s357_s4] sm:$0xff] %vm39_vm0, %v355_v18 }
 0x3ba   : > { %v371_v19 = vpop.permute.xlu0 %370 }
 0x3bb   : > { %373 = vst.msk [vmem:[#allocation5] sm:$0xff] %vm39_vm0, %v371_v19 }
 0x3bc PF:  { %v652_v21 = vld [vmem:[%s1089_s6] ss:$0 sm:$0xff]  ;;  %v541_v47 = vld [vmem:[%s1090_s7 + $0x8] sm:$0xff]  ;;  %v542_v48 = vld [vmem:[%s1090_s7 + $0x10] sm:$0xff]  ;;  %v814_v49 = vmov 0.0|0.0   ;;  %vm815_vm4 = vmmov 0   ;;  %v431_v57 = vstv %s1085_s0 }
 0x3bd   :  { %v540_v46 = vld [vmem:[%s1090_s7] sm:$0xff]  ;;  %738 = vmatprep.subr.bf16.mxu0 %v814_v49  ;;  %v543_v51 = vld [vmem:[%s1090_s7 + $0x18] sm:$0xff]  ;;  %721 = vmatprep.mubr.msk.f32.mxu0 %vm815_vm4, %v806_v3  ;;  %vm436_vm5 = vcmp.gt.s32.totalorder %v431_v57, 4  ;;  %vm432_vm6 = vcmp.gt.s32.totalorder %v431_v57, 0  ;;  %vm437_vm7 = vcmp.gt.s32.totalorder %v431_v57, 5  ;;  %vm433_vm8 = vcmp.gt.s32.totalorder %v431_v57, 1 }
 0x3be   :  { %v999_v20 = vld [vmem:[#allocation2 + $0x20] sm:$0xff]  ;;  %v1008_v25 = vld [vmem:[#allocation2 + $0x28] sm:$0xff]  ;;  %v1014_v1 = vld [vmem:[#allocation2 + $0x18] sm:$0xff]  ;;  %v739_v50 = vpack.c.bf16 %v541_v47, %v540_v46  ;;  %v742_v52 = vpack.c.bf16 %v543_v51, %v542_v48  ;;  %vm439_vm9 = vcmp.gt.s32.totalorder %v431_v57, 7  ;;  %vm438_vm10 = vcmp.gt.s32.totalorder %v431_v57, 6 }
 0x3bf   :  { %v1004_v22 = vld [vmem:[#allocation2] sm:$0xff]  ;;  %v395_v23 = vmul.f32 %v652_v21, %v999_v20  ;;  %v1010_v26 = vld [vmem:[#allocation2 + $0x8] sm:$0xff]  ;;  %v396_v27 = vmul.f32 %v652_v21, %v1008_v25  ;;  %v1016_v2 = vld [vmem:[#allocation2 + $0x10] sm:$0xff]  ;;  %v394_v30 = vmul.f32 %v652_v21, %v1014_v1  ;;  %vm435_vm11 = vcmp.gt.s32.totalorder %v431_v57, 3 }
 0x3c0   :  { %v391_v24 = vmul.f32 %v652_v21, %v1004_v22  ;;  %v392_v0 = vmul.f32 %v652_v21, %v1010_v26  ;;  %v393_v31 = vmul.f32 %v652_v21, %v1016_v2  ;;  %v1024_v32 = vld [vmem:[#allocation2 + $0x38] sm:$0xff]  ;;  %v1026_v33 = vld [vmem:[#allocation2 + $0x30] sm:$0xff]  ;;  %v1032_v38 = vld [vmem:[#allocation2 + $0x48] sm:$0xff]  ;;  %740 = vmatpush3.bf16.msra.mxu0 %v739_v50  ;;  %vm434_vm12 = vcmp.gt.s32.totalorder %v431_v57, 2 }
 0x3c1   :  { %v413_v4 = vsel %vm39_vm0, %v395_v23, 0.0  ;;  %v416_v28 = vsel %vm39_vm0, %v396_v27, 0.0  ;;  %v410_v34 = vsel %vm39_vm0, %v394_v30, 0.0  ;;  %v398_v36 = vmul.f32 %v652_v21, %v1024_v32  ;;  %v1034_v39 = vld [vmem:[#allocation2 + $0x40] sm:$0xff]  ;;  %741 = vmatprep.subr.bf16.mxu0 %v814_v49 }
 0x3c2   :  { %v401_v5 = vsel %vm39_vm0, %v391_v24, 0.0  ;;  %414 = vadd.xlane.f32.xlu1 %v413_v4  ;;  %v404_v29 = vsel %vm39_vm0, %v392_v0, 0.0  ;;  %v407_v35 = vsel %vm39_vm0, %v393_v31, 0.0  ;;  %v397_v37 = vmul.f32 %v652_v21, %v1026_v33 }
 0x3c3   :  { %402 = vadd.xlane.f32.xlu0 %v401_v5  ;;  %v422_v40 = vsel %vm39_vm0, %v398_v36, 0.0  ;;  %v400_v42 = vmul.f32 %v652_v21, %v1032_v38  ;;  %v399_v43 = vmul.f32 %v652_v21, %v1034_v39  ;;  %vm441_vm13 = vcmp.gt.s32.totalorder %v431_v57, 9 }
 0x3c4   :  { %v419_v41 = vsel %vm39_vm0, %v397_v37, 0.0  ;;  %743 = vmatpush3.bf16.msra.mxu0 %v742_v52  ;;  %vm440_vm14 = vcmp.gt.s32.totalorder %v431_v57, 8 }
 0x3c5   :  { %v428_v44 = vsel %vm39_vm0, %v400_v42, 0.0  ;;  %v425_v45 = vsel %vm39_vm0, %v399_v43, 0.0 }
 0x3c6   :  { %417 = vadd.xlane.f32.xlu1 %v416_v28 }
 0x3c7   :  { %405 = vadd.xlane.f32.xlu0 %v404_v29 }
 0x3ca   :  { %411 = vadd.xlane.f32.xlu1 %v410_v34 }
 0x3cb   :  { %408 = vadd.xlane.f32.xlu0 %v407_v35 }
 0x3ce   :  { %423 = vadd.xlane.f32.xlu1 %v422_v40 }
 0x3cf   :  { %420 = vadd.xlane.f32.xlu0 %v419_v41 }
 0x3d2   :  { %429 = vadd.xlane.f32.xlu1 %v428_v44 }
 0x3d3   :  { %426 = vadd.xlane.f32.xlu0 %v425_v45 }
 0x44f   :  { %v415_v53 = vpop.xlane.xlu1 %414 }
 0x450   :  { %v403_v54 = vpop.xlane.xlu0 %402  ;;  %v446_v3 = vsel %vm436_vm5, %v415_v53, -1e+30 }
 0x451   :  { %v442_v60 = vsel %vm432_vm6, %v403_v54, -1e+30 }
 0x452   :  { %v452_v11 = vmax.f32 %v442_v60, %v446_v3 }
 0x453   :  { %v418_v55 = vpop.xlane.xlu1 %417 }
 0x454   :  { %v406_v56 = vpop.xlane.xlu0 %405  ;;  %v447_v61 = vsel %vm437_vm7, %v418_v55, -1e+30 }
 0x455   :  { %v443_v6 = vsel %vm433_vm8, %v406_v56, -1e+30 }
 0x456   :  { %v453_v12 = vmax.f32 %v443_v6, %v447_v61 }
 0x457   :  { %v412_v58 = vpop.xlane.xlu1 %411 }
 0x458   :  { %v409_v59 = vpop.xlane.xlu0 %408  ;;  %v445_v9 = vsel %vm435_vm11, %v412_v58, -1e+30 }
 0x459   :  { %v444_v10 = vsel %vm434_vm12, %v409_v59, -1e+30 }
 0x45b   :  { %v424_v62 = vpop.xlane.xlu1 %423 }
 0x45c   :  { %v421_v63 = vpop.xlane.xlu0 %420  ;;  %v449_v7 = vsel %vm439_vm9, %v424_v62, -1e+30 }
 0x45d   :  { %v448_v8 = vsel %vm438_vm10, %v421_v63, -1e+30  ;;  %v455_v13 = vmax.f32 %v445_v9, %v449_v7 }
 0x45e   :  { %v454_v14 = vmax.f32 %v444_v10, %v448_v8 }
 0x45f   :  { %v430_v15 = vpop.xlane.xlu1 %429 }
 0x460   :  { %v427_v16 = vpop.xlane.xlu0 %426  ;;  %v451_v17 = vsel %vm441_vm13, %v430_v15, -1e+30  ;;  %v459_v23 = vmax.f32 %v454_v14, %v455_v13 }
 0x461   :  { %v450_v18 = vsel %vm440_vm14, %v427_v16, -1e+30  ;;  %v457_v19 = vmax.f32 %v453_v12, %v451_v17 }
 0x462   :  { %v456_v21 = vmax.f32 %v452_v11, %v450_v18 }
 0x464   :  { %v458_v24 = vmax.f32 %v456_v21, %v457_v19 }
 0x466   :  { %v460_v27 = vmax.f32 %v458_v24, %v459_v23 }
 0x468   :  { %v461_v0 = vsub.f32 %v442_v60, %v460_v27  ;;  %v462_v4 = vsub.f32 %v443_v6, %v460_v27  ;;  %v463_v5 = vsub.f32 %v444_v10, %v460_v27  ;;  %v464_v28 = vsub.f32 %v445_v9, %v460_v27 }
 0x469   :  { %v465_v31 = vsub.f32 %v446_v3, %v460_v27  ;;  %v466_v35 = vsub.f32 %v447_v61, %v460_v27  ;;  %v467_v37 = vsub.f32 %v448_v8, %v460_v27  ;;  %v468_v41 = vsub.f32 %v449_v7, %v460_v27 }
 0x46a   :  { %v471_v29 = vmul.f32 1.442695, %v461_v0  ;;  %v473_v30 = vmul.f32 1.442695, %v462_v4  ;;  %v475_v34 = vmul.f32 1.442695, %v463_v5  ;;  %v469_v43 = vsub.f32 %v450_v18, %v460_v27 }
 0x46b   :  { %v477_v36 = vmul.f32 1.442695, %v464_v28  ;;  %v479_v40 = vmul.f32 1.442695, %v465_v31  ;;  %v481_v42 = vmul.f32 1.442695, %v466_v35  ;;  %v470_v45 = vsub.f32 %v451_v17, %v460_v27 }
 0x46c   :  { %776 = vpow2.f32 %v471_v29  ;;  %v483_v44 = vmul.f32 1.442695, %v467_v37  ;;  %v485_v46 = vmul.f32 1.442695, %v468_v41  ;;  %v487_v49 = vmul.f32 1.442695, %v469_v43 }
 0x46d   :  { %778 = vpow2.f32 %v473_v30  ;;  %v489_v52 = vmul.f32 1.442695, %v470_v45 }
 0x46e   :  { %780 = vpow2.f32 %v475_v34 }
 0x46f   :  { %782 = vpow2.f32 %v477_v36 }
 0x470   :  { %784 = vpow2.f32 %v479_v40 }
 0x471   :  { %786 = vpow2.f32 %v481_v42 }
 0x472   :  { %788 = vpow2.f32 %v483_v44 }
 0x473   :  { %790 = vpow2.f32 %v485_v46 }
 0x474   :  { %792 = vpow2.f32 %v487_v49 }
 0x475   :  { %794 = vpow2.f32 %v489_v52 }
 0x476   :  { %v777_v47 = vpop.eup %776 }
 0x477   :  { %v779_v48 = vpop.eup %778 }
 0x478   :  { %v491_v50 = vadd.f32 %v779_v48, %v777_v47  ;;  %v781_v51 = vpop.eup %780 }
 0x479   :  { %v783_v54 = vpop.eup %782 }
 0x47a   :  { %v492_v53 = vadd.f32 %v781_v51, %v491_v50  ;;  %v785_v56 = vpop.eup %784 }
 0x47b   :  { %v787_v58 = vpop.eup %786 }
 0x47c   :  { %v493_v55 = vadd.f32 %v783_v54, %v492_v53  ;;  %v789_v3 = vpop.eup %788 }
 0x47d   :  { %v791_v61 = vpop.eup %790 }
 0x47e   :  { %v494_v57 = vadd.f32 %v785_v56, %v493_v55  ;;  %v793_v63 = vpop.eup %792 }
 0x47f   :  { %v795_v7 = vpop.eup %794 }
 0x480   :  { %v495_v59 = vadd.f32 %v787_v58, %v494_v57 }
 0x482   :  { %v496_v60 = vadd.f32 %v789_v3, %v495_v59 }
 0x484   :  { %v497_v62 = vadd.f32 %v791_v61, %v496_v60 }
 0x486   :  { %v498_v6 = vadd.f32 %v793_v63, %v497_v62 }
 0x488   :  { %v499_v8 = vadd.f32 %v795_v7, %v498_v6 }
 0x48a   :  { %796 = vrcp.f32 %v499_v8 }
 0x494   :  { %v797_v9 = vpop.eup %796 }
 0x495   :  { %v501_v10 = vmul.f32 %v797_v9, %v777_v47  ;;  %v502_v11 = vmul.f32 %v797_v9, %v779_v48  ;;  %v503_v12 = vmul.f32 %v797_v9, %v781_v51  ;;  %v504_v13 = vmul.f32 %v797_v9, %v783_v54 }
 0x496   :  { %v505_v16 = vmul.f32 %v797_v9, %v785_v56  ;;  %v506_v18 = vmul.f32 %v797_v9, %v787_v58  ;;  %v507_v27 = vmul.f32 %v797_v9, %v789_v3  ;;  %v509_v29 = vmul.f32 %v797_v9, %v793_v63 }
 0x497   :  { %v511_v14 = vmul.f32 %v501_v10, %v1004_v22  ;;  %v512_v15 = vmul.f32 %v502_v11, %v1010_v26  ;;  %v513_v17 = vmul.f32 %v503_v12, %v1016_v2  ;;  %v514_v19 = vmul.f32 %v504_v13, %v1014_v1 }
 0x498   :  { %v515_v0 = vmul.f32 %v505_v16, %v999_v20  ;;  %v508_v22 = vmul.f32 %v797_v9, %v791_v61  ;;  %v516_v26 = vmul.f32 %v506_v18, %v1008_v25  ;;  %v517_v1 = vmul.f32 %v507_v27, %v1026_v33 }
 0x499   :  { %v521_v21 = vsel %vm39_vm0, %v511_v14, 0.0  ;;  %v522_v23 = vsel %vm39_vm0, %v512_v15, 0.0  ;;  %v524_v4 = vsel %vm39_vm0, %v513_v17, 0.0  ;;  %v526_v28 = vsel %vm39_vm0, %v514_v19, 0.0 }
 0x49a   :  { %v523_v24 = vadd.f32 %v522_v23, %v521_v21  ;;  %v528_v30 = vsel %vm39_vm0, %v515_v0, 0.0  ;;  %v510_v34 = vmul.f32 %v797_v9, %v795_v7  ;;  %v518_v35 = vmul.f32 %v508_v22, %v1024_v32  ;;  %v653_v32 = vld [vmem:[%s1091_s8] ss:$0 sm:$0xff] }
 0x49b   :  { %v530_v20 = vsel %vm39_vm0, %v516_v26, 0.0  ;;  %v519_v37 = vmul.f32 %v509_v29, %v1034_v39  ;;  %v532_v40 = vsel %vm39_vm0, %v517_v1, 0.0 }
 0x49c   :  { %v525_v5 = vadd.f32 %v524_v4, %v523_v24  ;;  %v520_v41 = vmul.f32 %v510_v34, %v1032_v38  ;;  %v534_v42 = vsel %vm39_vm0, %v518_v35, 0.0 }
 0x49d   :  { %v536_v33 = vsel %vm39_vm0, %v519_v37, 0.0 }
 0x49e   :  { %v527_v2 = vadd.f32 %v526_v28, %v525_v5  ;;  %v538_v45 = vsel %vm39_vm0, %v520_v41, 0.0 }
 0x4a0   :  { %v529_v31 = vadd.f32 %v528_v30, %v527_v2 }
 0x4a2   :  { %v531_v36 = vadd.f32 %v530_v20, %v529_v31 }
 0x4a4   :  { %v533_v25 = vadd.f32 %v532_v40, %v531_v36 }
 0x4a6   :  { %v535_v43 = vadd.f32 %v534_v42, %v533_v25 }
 0x4a8   :  { %v537_v44 = vadd.f32 %v536_v33, %v535_v43 }
 0x4aa   :  { %v539_v46 = vadd.f32 %v538_v45, %v537_v44 }
 0x4ac   :  { %722 = vmatmul.mubr.msk.f32.vlgmr.msra.gmra.mrb[0].mxu0 %vm39_vm0, %v539_v46 }
 0x57f   :  { %v620_v39 = vpop.f32.mrb[0].mxu0 }
 0x580   :  { %v621_v47 = vadd.f32 %v653_v32, %v620_v39  ;;  %v723_v48 = vpop.f32.mrb[1].mxu0 }
 0x582   :  { %624 = vst [vmem:[%s1092_s9] sm:$0xff] %v621_v47 }

</bundles_post_ra>
